<compile_context>
chip_gen: v7x
topology: tpu7x:2x2x1
jax: 0.10.0
libtpu: 0.0.40
codegen_flags: <defaults>
</compile_context>

<pallas_src>
import functools
import math

import jax
import jax.numpy as jnp
from jax import lax
from jax.experimental import pallas as pl
from jax.experimental.pallas import tpu as pltpu

_NEG_LARGE = -1000000.0   # torch masked_softmax fill value (reference semantics)
_PAD_NEG = -2000000.0     # strictly below _NEG_LARGE: lane-padding key columns
                          # always underflow to exactly 0 after the softmax.


def _round_up(x, m):
    return ((x + m - 1) // m) * m


def _pick_tile(n_padded, candidates):
    for c in candidates:
        if n_padded % c == 0:
            return c
    return n_padded


def _vmem_capacity_bytes():
    try:
        info = pltpu.get_tpu_info()
        cap = getattr(info, "vmem_capacity_bytes", None)
        if cap:
            return int(cap)
    except Exception:
        pass
    return 64 * 1024 * 1024   # v7x-safe fallback


# ---------------------------------------------------------------------------
# Path A: fused single-pass kernel (K/V VMEM-resident)
# ---------------------------------------------------------------------------
def _fused_kernel(vrow_ref, q_ref, k_ref, v_ref, o_ref, *w_refs,
                  scale, k_real, has_kpad, apply_valid_mask, emit_weights):
    """vrow_ref: VMEM int32[TQ,1] per-row valid length (handles 1-D & 2-D valid_lens).
    q_ref [TQ,D] / k_ref [K_pad,D] / v_ref [K_pad,V_pad] in compute dtype.
    o_ref [TQ,V_pad]; optional w_refs[0] [TQ,K_pad] attention weights."""
    q = q_ref[...] * jnp.asarray(scale, q_ref.dtype)            # fold 1/sqrt(d) into Q
    s = lax.dot_general(q, k_ref[...], (((1,), (1,)), ((), ())),
                        preferred_element_type=jnp.float32)      # [TQ, K_pad]
    if apply_valid_mask or has_kpad:
        kidx = lax.broadcasted_iota(jnp.int32, s.shape, 1)
    if apply_valid_mask:
        # valid == 0 rows: every real column -> -1e6 => uniform 1/K (reference).
        s = jnp.where(kidx < vrow_ref[...], s, jnp.float32(_NEG_LARGE))
    if has_kpad:
        s = jnp.where(kidx < k_real, s, jnp.float32(_PAD_NEG))
    m = jnp.max(s, axis=-1, keepdims=True)
    p = jnp.exp(s - m)
    linv = pl.reciprocal(jnp.sum(p, axis=-1, keepdims=True), approx=False)
    w = p * linv
    o_ref[...] = lax.dot_general(
        w.astype(v_ref.dtype), v_ref[...], (((1,), (0,)), ((), ())),
        preferred_element_type=jnp.float32).astype(o_ref.dtype)
    if emit_weights:
        w_refs[0][...] = w.astype(w_refs[0].dtype)


# ---------------------------------------------------------------------------
# Path B: streaming flash kernel (online softmax over KV tiles)
# ---------------------------------------------------------------------------
def _flash_kernel(valid_ref, q_ref, k_ref, v_ref, *refs,
                  scale, k_real, has_kpad, apply_valid_mask, emit_stats):
    if emit_stats:
        o_ref, m_ref, linv_ref, qs_sc, m_sc, l_sc, acc_sc = refs
    else:
        o_ref, qs_sc, m_sc, l_sc, acc_sc = refs
        m_ref = linv_ref = None

    b = pl.program_id(0)
    ki = pl.program_id(2)
    nk = pl.num_programs(2)
    tk = k_ref.shape[0]
    kv_start = ki * tk
    valid = valid_ref[b]

    @pl.when(ki == 0)
    def _init():
        # fold 1/sqrt(d) into Q once per Q tile (hoisted out of the KV loop)
        qs_sc[...] = q_ref[...] * jnp.asarray(scale, q_ref.dtype)
        m_sc[...] = jnp.full_like(m_sc, -jnp.inf)
        l_sc[...] = jnp.zeros_like(l_sc)
        acc_sc[...] = jnp.zeros_like(acc_sc)

    # KV tiles entirely beyond valid_len contribute exactly 0 (exp(-1e6 - m)
    # underflows in f32): skip their compute; their DMA is elided by the
    # clamped index_map.  valid == 0 keeps every tile so the reference's
    # uniform-1/K behaviour is preserved.
    compute = jnp.logical_or(kv_start < valid, valid == 0)

    @pl.when(compute)
    def _tile():
        s = lax.dot_general(qs_sc[...], k_ref[...], (((1,), (1,)), ((), ())),
                            preferred_element_type=jnp.float32)
        # TODO(synk): gate the mask math to boundary tiles only (needs a vector
        # lax.cond); left unconditional to keep the Mosaic lowering simple.
        if apply_valid_mask or has_kpad:
            kidx = kv_start + lax.broadcasted_iota(jnp.int32, s.shape, 1)
        if apply_valid_mask:
            s = jnp.where(kidx < valid, s, jnp.float32(_NEG_LARGE))
        if has_kpad:
            s = jnp.where(kidx < k_real, s, jnp.float32(_PAD_NEG))
        m_prev = m_sc[...]
        m_new = jnp.maximum(m_prev, jnp.max(s, axis=-1, keepdims=True))
        alpha = jnp.exp(m_prev - m_new)
        p = jnp.exp(s - m_new)
        l_sc[...] = alpha * l_sc[...] + jnp.sum(p, axis=-1, keepdims=True)
        acc_sc[...] = alpha * acc_sc[...] + lax.dot_general(
            p.astype(v_ref.dtype), v_ref[...], (((1,), (0,)), ((), ())),
            preferred_element_type=jnp.float32)
        m_sc[...] = m_new

    @pl.when(ki == nk - 1)
    def _finalize():
        linv = pl.reciprocal(l_sc[...], approx=False)
        o_ref[...] = (acc_sc[...] * linv).astype(o_ref.dtype)
        if emit_stats:
            m_ref[...] = m_sc[...]
            linv_ref[...] = linv


def _weights_kernel(valid_ref, q_ref, k_ref, m_ref, linv_ref, w_ref,
                    *, scale, k_real, has_kpad, apply_valid_mask):
    """Reconstruct normalized attention weights per (Q, KV) tile (large-K path)."""
    b = pl.program_id(0)
    ki = pl.program_id(2)
    tk = k_ref.shape[0]
    kv_start = ki * tk
    valid = valid_ref[b]
    compute = jnp.logical_or(kv_start < valid, valid == 0)

    @pl.when(compute)
    def _():
        q = q_ref[...] * jnp.asarray(scale, q_ref.dtype)
        s = lax.dot_general(q, k_ref[...], (((1,), (1,)), ((), ())),
                            preferred_element_type=jnp.float32)
        if apply_valid_mask or has_kpad:
            kidx = kv_start + lax.broadcasted_iota(jnp.int32, s.shape, 1)
        if apply_valid_mask:
            s = jnp.where(kidx < valid, s, jnp.float32(_NEG_LARGE))
        if has_kpad:
            s = jnp.where(kidx < k_real, s, jnp.float32(_PAD_NEG))
        w = jnp.exp(s - m_ref[...]) * linv_ref[...]
        w_ref[...] = w.astype(w_ref.dtype)

    @pl.when(jnp.logical_not(compute))
    def _():
        # Fully-masked tile: exp(-1e6 - m) / l underflows to exactly 0.
        w_ref[...] = jnp.zeros_like(w_ref)


# ---------------------------------------------------------------------------
# Wrapper
# ---------------------------------------------------------------------------
def dot_product_attention(queries, keys, values, valid_lens=None,
                          return_weights=True, compute_dtype=None,
                          weights_dtype=None, _force_streaming=False):
    """queries [B,Q,D], keys [B,K,D], values [B,K,V]; valid_lens None, int[B] or int[B,Q].

    Returns (output [B,Q,V], attention_weights [B,Q,K] or None).
    Dropout is identity (inference semantics)."""
    B, Q, D = queries.shape
    _, K, _ = keys.shape
    V = values.shape[-1]
    out_dtype = queries.dtype

    if compute_dtype is None:
        # f32 callers get bf16 MXU operands + f32 accumulation (flash profile).
        compute_dtype = jnp.bfloat16 if out_dtype == jnp.float32 else out_dtype
    compute_dtype = jnp.dtype(compute_dtype)
    w_dtype = jnp.dtype(weights_dtype) if weights_dtype is not None else jnp.dtype(out_dtype)

    scale = 1.0 / math.sqrt(D)
    masking = valid_lens is not None
    valid_1d = None
    valid_2d = None
    if masking:
        vl = jnp.asarray(valid_lens)
        if vl.ndim == 1:
            valid_1d = jnp.clip(vl.astype(jnp.int32), 0, K)
        elif vl.ndim == 2:
            valid_2d = jnp.clip(vl.astype(jnp.int32), 0, K)
        else:
            raise ValueError("valid_lens must be 1-D or 2-D")

    cb = compute_dtype.itemsize
    ob = jnp.dtype(out_dtype).itemsize
    wb = w_dtype.itemsize
    sub = max(8, 32 // cb)            # sublane packing: f32 -> 8, bf16 -> 16, int8 -> 32

    K_pad = _round_up(K, 128)
    V_pad = _round_up(V, 128)
    has_kpad = K_pad > K

    vmem_cap = _vmem_capacity_bytes()
    vmem_limit = int(vmem_cap * 0.75)   # ~48 MiB on v7x (64 MiB), ~96 MiB on v5e/v6e
    budget = int(vmem_cap * 0.55)       # what our own tiling estimate may consume

    # ---- Q tiling for the K/V-resident single-pass path ---------------------
    Qp_a = _round_up(Q, sub)
    if Qp_a <= 512:
        TQ_a = Qp_a                     # single tile: minimal padded-row MXU/EUP work
    else:
        Qp_a = _round_up(Q, 128)
        TQ_a = _pick_tile(Qp_a, (512, 256, 128))
    if B * (Qp_a // TQ_a) < 2 and Q > sub:
        # keep both v7x TensorCores busy on tiny-batch shapes
        Qp_a = _round_up(Q, 2 * sub)
        TQ_a = Qp_a // 2

    def _fused_bytes(tq):
        n = 2 * tq * D * cb + 2 * K_pad * D * cb + 2 * K_pad * V_pad * cb   # Q, K, V
        n += 2 * tq * V_pad * ob                                            # O
        if return_weights:
            n += 2 * tq * K_pad * wb                                        # W
        n += 3 * tq * K_pad * 4 + tq * V_pad * 4                            # f32 temporaries
        return n

    use_fused = (not _force_streaming) and _fused_bytes(TQ_a) <= budget
    if valid_2d is not None and not use_fused:
        # TODO(synk): 2-D (per-query) valid_lens on the streaming large-K path.
        raise NotImplementedError(
            "2-D valid_lens is only supported when K/V fit the VMEM-resident path")

    def _pad3(x, n1, n2):
        p1, p2 = n1 - x.shape[1], n2 - x.shape[2]
        return jnp.pad(x, ((0, 0), (0, p1), (0, p2))) if (p1 or p2) else x

    q_c = queries.astype(compute_dtype)
    k_c = keys.astype(compute_dtype)
    v_c = values.astype(compute_dtype)

    # ======================= Path A: fused single-pass =======================
    if use_fused:
        Q_pad, TQ = Qp_a, TQ_a
        q_p = _pad3(q_c, Q_pad, D)
        k_p = _pad3(k_c, K_pad, D)
        v_p = _pad3(v_c, K_pad, V_pad)
        if valid_2d is not None:
            vrow = jnp.pad(valid_2d, ((0, 0), (0, Q_pad - Q)), constant_values=K)
        elif valid_1d is not None:
            vrow = jnp.broadcast_to(valid_1d[:, None], (B, Q_pad))
        else:
            vrow = jnp.full((B, Q_pad), K, dtype=jnp.int32)
        vrow = vrow[..., None]                     # (B, Q_pad, 1) int32

        o_sds = jax.ShapeDtypeStruct((B, Q_pad, V_pad), out_dtype)
        o_spec = pl.BlockSpec((None, TQ, V_pad), lambda b, qi: (b, qi, 0))
        if return_weights:
            out_shape = (o_sds, jax.ShapeDtypeStruct((B, Q_pad, K_pad), w_dtype))
            out_specs = (o_spec,
                         pl.BlockSpec((None, TQ, K_pad), lambda b, qi: (b, qi, 0)))
        else:
            out_shape = o_sds
            out_specs = o_spec

        res = pl.pallas_call(
            functools.partial(_fused_kernel, scale=scale, k_real=K,
                              has_kpad=has_kpad, apply_valid_mask=masking,
                              emit_weights=return_weights),
            out_shape=out_shape,
            grid_spec=pltpu.PrefetchScalarGridSpec(
                num_scalar_prefetch=0,
                grid=(B, Q_pad // TQ),
                in_specs=[
                    pl.BlockSpec((None, TQ, 1), lambda b, qi: (b, qi, 0)),
                    pl.BlockSpec((None, TQ, D), lambda b, qi: (b, qi, 0)),
                    # K/V block index depends only on b -> resident across Q tiles
                    pl.BlockSpec((None, K_pad, D), lambda b, qi: (b, 0, 0)),
                    pl.BlockSpec((None, K_pad, V_pad), lambda b, qi: (b, 0, 0)),
                ],
                out_specs=out_specs),
            compiler_params=pltpu.CompilerParams(
                dimension_semantics=("parallel", "parallel"),
                vmem_limit_bytes=vmem_limit),
        )(vrow, q_p, k_p, v_p)

        if return_weights:
            out_p, w_p = res
            return out_p[:, :Q, :V], w_p[:, :Q, :K]
        return res[:, :Q, :V], None

    # ====================== Path B: streaming flash path =====================
    valid = valid_1d if valid_1d is not None else jnp.full((B,), K, dtype=jnp.int32)

    Q_pad = _round_up(Q, 128) if Q > 128 else _round_up(Q, sub)
    TQ = _pick_tile(Q_pad, tuple(c for c in (256, 128, 64, 32, 16, 8) if c % sub == 0))
    if B * (Q_pad // TQ) < 2 and TQ % (2 * sub) == 0:
        TQ //= 2                                   # feed both v7x TensorCores

    def _stream_bytes(tk):
        n = 2 * TQ * D * cb + 2 * tk * D * cb + 2 * tk * V_pad * cb + 2 * TQ * V_pad * ob
        n += TQ * D * cb + 2 * TQ * 4 + TQ * V_pad * 4        # scratches
        n += 2 * TQ * tk * 4                                  # f32 temporaries
        return n

    TK = 128
    for c in (4096, 2048, 1024, 512, 256, 128):
        if K_pad % c == 0 and _stream_bytes(c) <= budget:
            TK = c
            break

    q_p = _pad3(q_c, Q_pad, D)
    k_p = _pad3(k_c, K_pad, D)
    v_p = _pad3(v_c, K_pad, V_pad)

    grid = (B, Q_pad // TQ, K_pad // TK)

    def kv_index(b, qi, ki, vl):
        # DMA elision: clamp the K/V block index so tiles entirely beyond
        # valid_len re-use the previous block (no HBM fetch); their compute is
        # skipped inside the kernel anyway.
        v = vl[b]
        last = jnp.maximum(v - 1, 0) // TK
        return (b, jnp.where(v == 0, ki, jnp.minimum(ki, last)), 0)

    o_sds = jax.ShapeDtypeStruct((B, Q_pad, V_pad), out_dtype)
    o_spec = pl.BlockSpec((None, TQ, V_pad), lambda b, qi, ki, vl: (b, qi, 0))
    stat_spec = pl.BlockSpec((None, TQ, 1), lambda b, qi, ki, vl: (b, qi, 0))
    if return_weights:
        out_shape = (o_sds,
                     jax.ShapeDtypeStruct((B, Q_pad, 1), jnp.float32),
                     jax.ShapeDtypeStruct((B, Q_pad, 1), jnp.float32))
        out_specs = (o_spec, stat_spec, stat_spec)
    else:
        out_shape = o_sds
        out_specs = o_spec

    # TODO(synk): sweep pipeline_mode=pl.Buffered(3) on the K/V in_specs for
    # small D+V_pad shapes where the per-step DMA is longer than the compute.
    res = pl.pallas_call(
        functools.partial(_flash_kernel, scale=scale, k_real=K, has_kpad=has_kpad,
                          apply_valid_mask=masking, emit_stats=return_weights),
        out_shape=out_shape,
        grid_spec=pltpu.PrefetchScalarGridSpec(
            num_scalar_prefetch=1,
            grid=grid,
            in_specs=[
                pl.BlockSpec((None, TQ, D), lambda b, qi, ki, vl: (b, qi, 0)),
                pl.BlockSpec((None, TK, D), kv_index),
                pl.BlockSpec((None, TK, V_pad), kv_index),
            ],
            out_specs=out_specs,
            scratch_shapes=[
                pltpu.VMEM((TQ, D), compute_dtype),    # scaled Q (hoisted)
                pltpu.VMEM((TQ, 1), jnp.float32),      # running max
                pltpu.VMEM((TQ, 1), jnp.float32),      # running sum
                pltpu.VMEM((TQ, V_pad), jnp.float32),  # output accumulator
            ]),
        compiler_params=pltpu.CompilerParams(
            dimension_semantics=("parallel", "parallel", "arbitrary"),
            vmem_limit_bytes=vmem_limit),
    )(valid, q_p, k_p, v_p)

    if not return_weights:
        return res[:, :Q, :V], None

    out_p, m_p, linv_p = res

    w_p = pl.pallas_call(
        functools.partial(_weights_kernel, scale=scale, k_real=K, has_kpad=has_kpad,
                          apply_valid_mask=masking),
        out_shape=jax.ShapeDtypeStruct((B, Q_pad, K_pad), w_dtype),
        grid_spec=pltpu.PrefetchScalarGridSpec(
            num_scalar_prefetch=1,
            grid=grid,
            in_specs=[
                pl.BlockSpec((None, TQ, D), lambda b, qi, ki, vl: (b, qi, 0)),
                pl.BlockSpec((None, TK, D), kv_index),
                pl.BlockSpec((None, TQ, 1), lambda b, qi, ki, vl: (b, qi, 0)),
                pl.BlockSpec((None, TQ, 1), lambda b, qi, ki, vl: (b, qi, 0)),
            ],
            out_specs=pl.BlockSpec((None, TQ, TK), lambda b, qi, ki, vl: (b, qi, ki))),
        compiler_params=pltpu.CompilerParams(
            dimension_semantics=("parallel", "parallel", "parallel"),
            vmem_limit_bytes=vmem_limit),
    )(valid, q_p, k_p, m_p, linv_p)

    return out_p[:, :Q, :V], w_p[:, :Q, :K]


# ---------------------------------------------------------------------------
# Pure-JAX reference & checks
# ---------------------------------------------------------------------------
def _reference(queries, keys, values, valid_lens):
    d = queries.shape[-1]
    scores = jnp.einsum("bqd,bkd->bqk", queries, keys) / math.sqrt(d)
    if valid_lens is not None:
        kidx = jnp.arange(keys.shape[1])
        if valid_lens.ndim == 1:
            mask = kidx[None, None, :] < valid_lens[:, None, None]
        else:
            mask = kidx[None, None, :] < valid_lens[:, :, None]
        scores = jnp.where(mask, scores, _NEG_LARGE)
    w = jax.nn.softmax(scores, axis=-1)
    return jnp.einsum("bqk,bkv->bqv", w, values), w


def _check(q, k, v, vl, atol, rtol, **kwargs):
    out, w = dot_product_attention(q, k, v, vl, **kwargs)
    out = jax.block_until_ready(out).astype(jnp.float32)
    w = jax.block_until_ready(w).astype(jnp.float32)
    ref_out, ref_w = _reference(q, k, v, vl)
    assert jnp.allclose(out, ref_out, atol=atol, rtol=rtol), (
        "output mismatch: max abs err = %g" % float(jnp.max(jnp.abs(out - ref_out))))
    assert jnp.allclose(w, ref_w, atol=atol, rtol=rtol), (
        "weights mismatch: max abs err = %g" % float(jnp.max(jnp.abs(w - ref_w))))


if __name__ == "__main__":
    # Case 1: small shapes implied by the module (single tile, fused path).
    B, Q, K, D, V = 2, 8, 16, 32, 32
    kq, kk, kv = jax.random.split(jax.random.PRNGKey(0), 3)
    q1 = jax.random.normal(kq, (B, Q, D), dtype=jnp.float32)
    k1 = jax.random.normal(kk, (B, K, D), dtype=jnp.float32)
    v1 = jax.random.normal(kv, (B, K, V), dtype=jnp.float32)
    vl1 = jnp.array([5, 12], dtype=jnp.int32)

    # default: bf16 MXU operands + f32 accumulation (loose tolerance)
    _check(q1, k1, v1, vl1, atol=3e-2, rtol=3e-2)
    _check(q1, k1, v1, None, atol=3e-2, rtol=3e-2)
    _check(q1, k1, v1, jnp.array([0, 16], dtype=jnp.int32), atol=3e-2, rtol=3e-2)
    # explicit full-f32 compute path (tight tolerance)
    _check(q1, k1, v1, vl1, atol=1e-4, rtol=1e-4, compute_dtype=jnp.float32)
    # 2-D (per-query) valid_lens
    vl2d = jnp.tile(jnp.arange(1, Q + 1, dtype=jnp.int32)[None, :], (B, 1))
    _check(q1, k1, v1, vl2d, atol=3e-2, rtol=3e-2)
    # output-only fast path
    o, w_none = dot_product_attention(q1, k1, v1, vl1, return_weights=False)
    jax.block_until_ready(o)
    assert w_none is None

    # Case 2: multi-tile shapes (non-aligned Q/K/V); exercise both paths.
    B, Q, K, D, V = 2, 130, 260, 64, 96
    kq, kk, kv = jax.random.split(jax.random.PRNGKey(1), 3)
    q2 = jax.random.normal(kq, (B, Q, D), dtype=jnp.float32)
    k2 = jax.random.normal(kk, (B, K, D), dtype=jnp.float32)
    v2 = jax.random.normal(kv, (B, K, V), dtype=jnp.float32)
    vl2 = jnp.array([100, 260], dtype=jnp.int32)

    _check(q2, k2, v2, vl2, atol=3e-2, rtol=3e-2)                       # fused path
    _check(q2, k2, v2, vl2, atol=3e-2, rtol=3e-2, _force_streaming=True)  # flash + weights pass
    _check(q2, k2, v2, vl2, atol=1e-4, rtol=1e-4,
           compute_dtype=jnp.float32, _force_streaming=True)
    o, _ = dot_product_attention(q2, k2, v2, vl2, return_weights=False,
                                 _force_streaming=True)
    jax.block_until_ready(o)

    print("KERNEL_OK")
</pallas_src>

<mosaic_0001>
module attributes {stable_mosaic.version = 11 : i64} {
  func.func @_fused_kernel(%arg0: i32, %arg1: i32, %arg2: memref<1x16x1xi32, #tpu.memory_space<vmem>>, %arg3: memref<1x16x32xbf16, #tpu.memory_space<vmem>>, %arg4: memref<1x128x32xbf16, #tpu.memory_space<vmem>>, %arg5: memref<1x128x128xbf16, #tpu.memory_space<vmem>>, %arg6: memref<1x16x128xf32, #tpu.memory_space<vmem>>, %arg7: memref<1x16x128xf32, #tpu.memory_space<vmem>>) attributes {dimension_semantics = [#tpu.dimension_semantics<parallel>, #tpu.dimension_semantics<parallel>], iteration_bounds = array<i64: 2, 1>, scalar_prefetch = 0 : i64, scratch_operands = 0 : i64, tpu.core_type = #tpu.core_type<tc>, window_params = [{transform_indices = @transform_0, window_bounds = array<i64: 1, 16, 1>}, {transform_indices = @transform_1, window_bounds = array<i64: 1, 16, 32>}, {transform_indices = @transform_2, window_bounds = array<i64: 1, 128, 32>}, {transform_indices = @transform_3, window_bounds = array<i64: 1, 128, 128>}, {transform_indices = @transform_4, window_bounds = array<i64: 1, 16, 128>}, {transform_indices = @transform_5, window_bounds = array<i64: 1, 16, 128>}]} {
    %c0 = arith.constant 0 : index
    %c0_0 = arith.constant 0 : index
    %c0_1 = arith.constant 0 : index
    %0 = vector.load %arg3[%c0, %c0_0, %c0_1] : memref<1x16x32xbf16, #tpu.memory_space<vmem>>, vector<1x16x32xbf16>
    %1 = vector.shape_cast %0 : vector<1x16x32xbf16> to vector<16x32xbf16>
    %cst = arith.constant 1.767580e-01 : bf16
    %2 = vector.broadcast %cst : bf16 to vector<16x32xbf16>
    %3 = arith.mulf %1, %2 : vector<16x32xbf16>
    %c0_2 = arith.constant 0 : index
    %c0_3 = arith.constant 0 : index
    %c0_4 = arith.constant 0 : index
    %4 = vector.load %arg4[%c0_2, %c0_3, %c0_4] : memref<1x128x32xbf16, #tpu.memory_space<vmem>>, vector<1x128x32xbf16>
    %5 = vector.shape_cast %4 : vector<1x128x32xbf16> to vector<128x32xbf16>
    %cst_5 = arith.constant dense<0.000000e+00> : vector<16x128xf32>
    %6 = tpu.matmul %3, %5, %cst_5 {dimension_numbers = #tpu.dot_dimension_numbers<[1], [1], [0], [0], [0, 0, 1, 0], [], []>} : vector<16x32xbf16>, vector<128x32xbf16>, vector<16x128xf32> -> vector<16x128xf32>
    %7 = tpu.iota {dimensions = array<i32: 1>} : vector<16x128xi32>
    %c0_6 = arith.constant 0 : index
    %c0_7 = arith.constant 0 : index
    %c0_8 = arith.constant 0 : index
    %8 = vector.load %arg2[%c0_6, %c0_7, %c0_8] : memref<1x16x1xi32, #tpu.memory_space<vmem>>, vector<1x16x1xi32>
    %9 = vector.shape_cast %8 : vector<1x16x1xi32> to vector<16x1xi32>
    %10 = vector.broadcast %9 : vector<16x1xi32> to vector<16x128xi32>
    %11 = arith.cmpi slt, %7, %10 : vector<16x128xi32>
    %cst_9 = arith.constant -1.000000e+06 : f32
    %12 = vector.broadcast %cst_9 : f32 to vector<16x128xf32>
    %13 = arith.select %11, %6, %12 : vector<16x128xi1>, vector<16x128xf32>
    %c16_i32 = arith.constant 16 : i32
    %14 = vector.broadcast %c16_i32 : i32 to vector<16x128xi32>
    %15 = arith.cmpi slt, %7, %14 : vector<16x128xi32>
    %cst_10 = arith.constant -2.000000e+06 : f32
    %16 = vector.broadcast %cst_10 : f32 to vector<16x128xf32>
    %17 = arith.select %15, %13, %16 : vector<16x128xi1>, vector<16x128xf32>
    %cst_11 = arith.constant dense<0xFF800000> : vector<16xf32>
    %18 = vector.multi_reduction <maximumf>, %17, %cst_11 [1] : vector<16x128xf32> to vector<16xf32>
    %19 = vector.shape_cast %18 : vector<16xf32> to vector<16x1xf32>
    %20 = vector.broadcast %19 : vector<16x1xf32> to vector<16x128xf32>
    %21 = arith.subf %17, %20 : vector<16x128xf32>
    %22 = math.exp %21 : vector<16x128xf32>
    %cst_12 = arith.constant dense<0.000000e+00> : vector<16xf32>
    %23 = vector.multi_reduction <add>, %22, %cst_12 [1] : vector<16x128xf32> to vector<16xf32>
    %24 = vector.shape_cast %23 : vector<16xf32> to vector<16x1xf32>
    %25 = tpu.reciprocal %24 : vector<16x1xf32> -> vector<16x1xf32>
    %26 = vector.broadcast %25 : vector<16x1xf32> to vector<16x128xf32>
    %27 = arith.mulf %22, %26 : vector<16x128xf32>
    %28 = arith.truncf %27 : vector<16x128xf32> to vector<16x128xbf16>
    %c0_13 = arith.constant 0 : index
    %c0_14 = arith.constant 0 : index
    %c0_15 = arith.constant 0 : index
    %29 = vector.load %arg5[%c0_13, %c0_14, %c0_15] : memref<1x128x128xbf16, #tpu.memory_space<vmem>>, vector<1x128x128xbf16>
    %30 = vector.shape_cast %29 : vector<1x128x128xbf16> to vector<128x128xbf16>
    %cst_16 = arith.constant dense<0.000000e+00> : vector<16x128xf32>
    %31 = tpu.matmul %28, %30, %cst_16 {dimension_numbers = #tpu.dot_dimension_numbers<[1], [0], [0], [1], [0, 0, 1, 1], [], []>} : vector<16x128xbf16>, vector<128x128xbf16>, vector<16x128xf32> -> vector<16x128xf32>
    %c0_17 = arith.constant 0 : index
    %c0_18 = arith.constant 0 : index
    %c0_19 = arith.constant 0 : index
    %32 = vector.load %arg6[%c0_17, %c0_18, %c0_19] : memref<1x16x128xf32, #tpu.memory_space<vmem>>, vector<1x16x128xf32>
    %33 = vector.shape_cast %32 : vector<1x16x128xf32> to vector<16x128xf32>
    %34 = vector.shape_cast %31 : vector<16x128xf32> to vector<1x16x128xf32>
    tpu.vector_store %arg6[%c0_17, %c0_18, %c0_19], %34 {strides = array<i32>} : memref<1x16x128xf32, #tpu.memory_space<vmem>>, vector<1x16x128xf32>,
    %c0_20 = arith.constant 0 : index
    %c0_21 = arith.constant 0 : index
    %c0_22 = arith.constant 0 : index
    %35 = vector.load %arg7[%c0_20, %c0_21, %c0_22] : memref<1x16x128xf32, #tpu.memory_space<vmem>>, vector<1x16x128xf32>
    %36 = vector.shape_cast %35 : vector<1x16x128xf32> to vector<16x128xf32>
    %37 = vector.shape_cast %27 : vector<16x128xf32> to vector<1x16x128xf32>
    tpu.vector_store %arg7[%c0_20, %c0_21, %c0_22], %37 {strides = array<i32>} : memref<1x16x128xf32, #tpu.memory_space<vmem>>, vector<1x16x128xf32>,
    return
  }
  func.func @transform_0(%arg0: i32, %arg1: i32) -> (i32, i32, i32) {
    %c0_i32 = arith.constant 0 : i32
    %c0_i32_0 = arith.constant 0 : i32
    return %arg0, %arg1, %c0_i32 : i32, i32, i32
  }
  func.func @transform_1(%arg0: i32, %arg1: i32) -> (i32, i32, i32) {
    %c0_i32 = arith.constant 0 : i32
    %c0_i32_0 = arith.constant 0 : i32
    return %arg0, %arg1, %c0_i32 : i32, i32, i32
  }
  func.func @transform_2(%arg0: i32, %arg1: i32) -> (i32, i32, i32) {
    %c0_i32 = arith.constant 0 : i32
    %c0_i32_0 = arith.constant 0 : i32
    %c0_i32_1 = arith.constant 0 : i32
    return %arg0, %c0_i32, %c0_i32_0 : i32, i32, i32
  }
  func.func @transform_3(%arg0: i32, %arg1: i32) -> (i32, i32, i32) {
    %c0_i32 = arith.constant 0 : i32
    %c0_i32_0 = arith.constant 0 : i32
    %c0_i32_1 = arith.constant 0 : i32
    return %arg0, %c0_i32, %c0_i32_0 : i32, i32, i32
  }
  func.func @transform_4(%arg0: i32, %arg1: i32) -> (i32, i32, i32) {
    %c0_i32 = arith.constant 0 : i32
    %c0_i32_0 = arith.constant 0 : i32
    return %arg0, %arg1, %c0_i32 : i32, i32, i32
  }
  func.func @transform_5(%arg0: i32, %arg1: i32) -> (i32, i32, i32) {
    %c0_i32 = arith.constant 0 : i32
    %c0_i32_0 = arith.constant 0 : i32
    return %arg0, %arg1, %c0_i32 : i32, i32, i32
  }
}

</mosaic_0001>

<bundles_post_ra>
// kernel: tpu_custom_call.1
= control target key start
LH: loop header
LB: loop body
LE: loop exit
PB: predicated region body
PF: predicated region fallthrough
CT: control target
= control target key end

     0   :  { %11 = vsyncpa [#allocation3], 0  ;;  %s1392_s0 = inlined_call_operand.vmem [shape: s32[2,16,1], index: 0, kind: input, shape index: {}]   ;;  %s1393_s1 = inlined_call_operand.vmem [shape: bf16[2,16,32], index: 1, kind: input, shape index: {}]   ;;  %s1394_s2 = inlined_call_operand.vmem [shape: bf16[2,128,32], index: 2, kind: input, shape index: {}]   ;;  %s1395_s3 = inlined_call_operand.vmem [shape: bf16[2,128,128], index: 3, kind: input, shape index: {}]   ;;  %s1396_s4 = inlined_call_operand.hbm [shape: f32[2,16,128], index: 4, kind: output, shape index: {0}]   ;;  %s1397_s5 = inlined_call_operand.hbm [shape: f32[2,16,128], index: 5, kind: output, shape index: {1}]  }
   0x1   :  { %13 = vsyncpa [#allocation3 + $0x1], 0 }
   0x2   :  { %14 = vsyncpa [#allocation5], 0 }
   0x3   :  { %16 = vsyncpa [#allocation5 + $0x1], 0  ;;  %s1164_s18 = smov 0   ;;  %s1166_s19 = smov 0  }
   0x4   :  { %s1168_s20 = smov 0   ;;  %s1170_s21 = smov 0  }
   0x5   :  { %s1172_s22 = smov 0   ;;  %s1174_s23 = smov 0  }
   0x6 LB: > { %s820_s24 = sadd.s32 4294967295, %s1125_s23   ;;  %s821_s25 = sadd.s32 4294967294, %s1125_s23   ;;  %s1125_s23 = sphi %s1174_s23, %s22_s23   ;;  %s1121_s22 = sphi %s1172_s22, %s1404_s22   ;;  %s1117_s21 = sphi %s1170_s21, %s1403_s21   ;;  %s1113_s20 = sphi %s1168_s20, %s1402_s20   ;;  %s1109_s19 = sphi %s1166_s19, %s1401_s19   ;;  %s1105_s18 = sphi %s1164_s18, %s1400_s18  }
   0x7   : > { %s34_s26 = sadd.s32 1, %s1121_s22  ;;  %s151_s27 = sadd.s32 1, %s1113_s20 }
   0x8   : > { %p36_p0 = scmp.ge.s32.totalorder %s34_s26, 2  ;;  %p161_p1 = scmp.ne.s32.totalorder %s1113_s20, %s1109_s19 }
   0x9   : > { %p162_p2 = scmp.eq.s32.totalorder %s820_s24, 1  ;;  %p167_p3 = scmp.ne.s32.totalorder %s1109_s19, %s1105_s18 }
   0xa   : > { %s1406_s26 = smov (%p36_p0, %s34_s26), 0  ;;  %p168_p5 = scmp.eq.s32.totalorder %s821_s25, 1 }
   0xb   : > { %p1204_p4 = por %p162_p2, %p161_p1  ;;  %s146_s29 = ssub.s32 %s1121_s22, %s1406_s26 }
   0xc   : > { %p824_p6 = scmp.ge.s32.totalorder %s1125_s23, 1  ;;  %p149_p7 = scmp.eq.s32.totalorder %s146_s29, 0 }
   0xd   : > { %p1211_p8 = por %p168_p5, %p167_p3  ;;  %p256_p9 = scmp.lt.s32.totalorder %s1125_s23, 3 }
   0xe   : > { %s1217_s6 = scalar_select %p149_p7, %s1113_s20, %s151_s27  }
   0xf   : > { %p257_p10 = pnand %p824_p6, %p256_p9 }
  0x10   : > { %p313_p11 = scmp.lt.s32.totalorder (!%p257_p10), %s1117_s21, 1  ;;  %v1127_v0 = vmov (!%p257_p10), 0.0   ;;  %vm1128_vm0 = vmmov (!%p257_p10), 0   ;;  %v1129_v1 = vmov (!%p257_p10), 0   ;;  %vm411_vm1 = vcmask (!%p257_p10), 261120   ;;  %s1130_s24 = smov (!%p257_p10), [#allocation4]  }
  0x11   : > { %260 = sbr.rel (%p257_p10) target bundleno = 853 (0x355), region = 36  ;;  %885 = vmatprep.subr.bf16.mxu0 (!%p257_p10), %v1127_v0  ;;  %901 = vmatprep.mubr.msk.bf16.mxu0 (!%p257_p10), %vm1128_vm0, %v1127_v0  ;;  %v480_v25 = vlaneseq (!%p257_p10) }
  0x12   : > { %990 = vset.pattern.permute.xlu0 (!%p257_p10), %v1129_v1  ;;  %905 = vmatprep.subr.bf16.mxu1 (!%p257_p10), %v1127_v0 }
  0x13   : > { %921 = vmatprep.mubr.msk.bf16.mxu1 (!%p257_p10), %vm1128_vm0, %v1127_v0  ;;  %v481_v27 = vand.u32 (!%p257_p10), 127, %v480_v25 }
  0x15   : > { %vm494_vm3 = vcmp.lt.s32.totalorder (!%p257_p10), %v481_v27, 16 }
  0x18   : > { %s1223_s7 = scalar_select %p313_p11, %s1117_s21, 1 }
  0x1a   : > { %s863_s8 = sshll.u32 %s1223_s7, 6  ;;  %s861_s12 = sshll.u32 %s1223_s7, 4 }
  0x1b   : > { %s1233_s11 = scalar_lea.vmem %s1394_s2, %s863_s8  ;;  %s320_s15 = scalar_lea.vmem %s1392_s0, %s861_s12 }
  0x1c   : > { %v991_v2 = vld [vmem:[%s1233_s11] sm:$0xff]   ;;  %v992_v4 = vld [vmem:[%s1233_s11 + $0x8] sm:$0xff]   ;;  %v993_v8 = vld [vmem:[%s1233_s11 + $0x10] sm:$0xff]   ;;  %s862_s16 = sshll.u32 %s1223_s7, 3  ;;  %s1272_s9 = scalar_lea.vmem %s1395_s3, %s863_s8 }
  0x1d   : > { %v416_v3 = vsel %vm411_vm1, %v991_v2, 0  ;;  %v419_v5 = vsel %vm411_vm1, %v992_v4, 0  ;;  %v482_v6 = vld [vmem:[%s320_s15] sm:$0xff]  ;;  %v483_v7 = vld [vmem:[%s320_s15 + $0x8] sm:$0xff]  ;;  %v422_v9 = vsel %vm411_vm1, %v993_v8, 0  ;;  %v994_v10 = vld [vmem:[%s1233_s11 + $0x18] sm:$0xff]   ;;  %s330_s25 = scalar_lea.vmem %s1393_s1, %s862_s16 }
  0x1e   : > { %886 = vmatpush3.bf16.xpose.msra.mxu0 %v416_v3  ;;  %485 = vperm.xlu0 %990, %v482_v6   ;;  %v425_v11 = vsel %vm411_vm1, %v994_v10, 0  ;;  %v995_v12 = vld [vmem:[%s1233_s11 + $0x20] sm:$0xff]   ;;  %v996_v14 = vld [vmem:[%s1233_s11 + $0x28] sm:$0xff]   ;;  %v997_v16 = vld [vmem:[%s1233_s11 + $0x30] sm:$0xff]   ;;  %s1290_s7 = sand.u32 1, %s1109_s19   ;;  %s865_s12 = sshll.u32 %s1117_s21, 8 }
  0x1f   : > { %887 = vmatprep.subr.bf16.mxu0 %v1127_v0  ;;  %v428_v13 = vsel %vm411_vm1, %v995_v12, 0  ;;  %v431_v15 = vsel %vm411_vm1, %v996_v14, 0  ;;  %v434_v17 = vsel %vm411_vm1, %v997_v16, 0  ;;  %v998_v18 = vld [vmem:[%s1233_s11 + $0x38] sm:$0xff]   ;;  %v346_v19 = vld [vmem:[%s330_s25] sm:$0xf]  ;;  %s1303_s15 = scalar_lea.hbm %s1397_s5, %s865_s12 }
  0x20   : > { %v347_v20 = vld [vmem:[%s330_s25 + $0x4] sm:$0xf]  ;;  %v437_v21 = vsel %vm411_vm1, %v998_v18, 0  ;;  %v348_v22 = vmul.bf16 1043676725, %v346_v19  ;;  %v1000_v38 = vld [vmem:[%s1272_s9 + $0x8] sm:$0xff]  }
  0x21   : > { %v349_v23 = vmul.bf16 1043676725, %v347_v20  ;;  %v999_v37 = vld [vmem:[%s1272_s9] sm:$0xff]   ;;  %v1001_v39 = vld [vmem:[%s1272_s9 + $0x10] sm:$0xff]   ;;  %v1002_v48 = vld [vmem:[%s1272_s9 + $0x18] sm:$0xff]   ;;  %s825_s8 = sshll.u32 %s1290_s7, 4 }
  0x22   : > { %488 = vperm.xlu0 %990, %v483_v7   ;;  %906 = vmatpush3.bf16.msra.mxu1 %v999_v37  ;;  %v1003_v49 = vld [vmem:[%s1272_s9 + $0x20] sm:$0xff]   ;;  %v1004_v50 = vld [vmem:[%s1272_s9 + $0x28] sm:$0xff]   ;;  %v1005_v51 = vld [vmem:[%s1272_s9 + $0x30] sm:$0xff]   ;;  %s311_s10 = scalar_lea.vmem [#allocation4], %s825_s8  ;;  %s631_s16 = scalar_lea.sflag [#allocation5], %s1290_s7 }
  0x23   : > { %v835_v24 = vcombine.low %v348_v22, %v349_v23  ;;  %907 = vmatprep.subr.bf16.mxu1 %v1127_v0  ;;  %v1006_v52 = vld [vmem:[%s1272_s9 + $0x38] sm:$0xff]   ;;  %s664_s11 = sshll.u32 %s311_s10, 4  ;;  %s1019_s25 = sshll.u32 %s1130_s24, 4  ;;  %s1295_s11 = int_to_ptr.vmem [resolvable:$true] %s664_s11  ;;  %s1020_s25 = int_to_ptr.vmem [resolvable:$false] %s1019_s25 }
  0x24   : > { %s1015_s17 = scalar_lea.vmem %s1295_s11, 256  ;;  %s1021_s27 = scalar_lea.vmem %s1020_s25, 512 }
  0x25   : > { %p1016_p12 = scmp.ne.s32.totalorder %s1295_s11, %s1015_s17  ;;  %p1022_p1 = scmp.lt.s32.totalorder %s1295_s11, %s1020_s25 }
  0x26   : > { %888 = vmatpush3.bf16.xpose.msra.mxu0 %v419_v5  ;;  %908 = vmatpush3.bf16.msra.mxu1 %v1000_v38  ;;  %p1023_p2 = scmp.lt.s32.totalorder %s1021_s27, %s1015_s17 }
  0x27   : > { %889 = vmatprep.subr.bf16.mxu0 %v1127_v0  ;;  %909 = vmatprep.subr.bf16.mxu1 %v1127_v0  ;;  %p1017_p13 = pnand %p1016_p12, %p1204_p4 }
  0x28   : > { %p1024_p3 = por %p1023_p2, %p1022_p1 }
  0x29   : > { %p1018_p0 = pneg %p1017_p13 }
  0x2a   : > { %910 = vmatpush3.bf16.msra.mxu1 %v1001_v39 }
  0x2b   : > { %911 = vmatprep.subr.bf16.mxu1 %v1127_v0  ;;  %p1025_p5 = pnand %p1024_p3, %p1018_p0 }
  0x2e   : > { %890 = vmatpush3.bf16.xpose.msra.mxu0 %v422_v9  ;;  %912 = vmatpush3.bf16.msra.mxu1 %v1002_v48 }
  0x2f   : > { %891 = vmatprep.subr.bf16.mxu0 %v1127_v0  ;;  %913 = vmatprep.subr.bf16.mxu1 %v1127_v0 }
  0x32   : > { %914 = vmatpush3.bf16.msra.mxu1 %v1003_v49 }
  0x33   : > { %915 = vmatprep.subr.bf16.mxu1 %v1127_v0 }
  0x36   : > { %892 = vmatpush3.bf16.xpose.msra.mxu0 %v425_v11  ;;  %916 = vmatpush3.bf16.msra.mxu1 %v1004_v50 }
  0x37   : > { %893 = vmatprep.subr.bf16.mxu0 %v1127_v0  ;;  %917 = vmatprep.subr.bf16.mxu1 %v1127_v0 }
  0x3a   : > { %918 = vmatpush3.bf16.msra.mxu1 %v1005_v51 }
  0x3b   : > { %919 = vmatprep.subr.bf16.mxu1 %v1127_v0 }
  0x3e   : > { %894 = vmatpush3.bf16.xpose.msra.mxu0 %v428_v13  ;;  %920 = vmatpush3.bf16.msra.mxu1 %v1006_v52 }
  0x3f   : > { %895 = vmatprep.subr.bf16.mxu0 %v1127_v0 }
  0x46   : > { %896 = vmatpush3.bf16.xpose.msra.mxu0 %v431_v15 }
  0x47   : > { %897 = vmatprep.subr.bf16.mxu0 %v1127_v0 }
  0x4e   : > { %898 = vmatpush3.bf16.xpose.msra.mxu0 %v434_v17 }
  0x4f   : > { %899 = vmatprep.subr.bf16.mxu0 %v1127_v0 }
  0x56   : > { %900 = vmatpush3.bf16.xpose.msra.mxu0 %v437_v21 }
  0x5d   : > { %902 = vmatmul.mubr.msk.bf16.vlgmr.msra.gmra.mrb[0].mxu0 %vm411_vm1, %v835_v24 }
  0x9d   : > { %v486_v26 = vpop.permute.xlu0 %485 }
  0x9e   : > { %vm490_vm2 = vcmp.lt.s32.totalorder %v481_v27, %v486_v26 }
  0xa1   : > { %v489_v28 = vpop.permute.xlu0 %488 }
  0xa2   : > { %vm491_vm4 = vcmp.lt.s32.totalorder %v481_v27, %v489_v28 }
 0x130   : > { %v473_v29 = vpop.f32.mrb[0].mxu0 }
 0x131   : > { %v492_v30 = vsel %vm490_vm2, %v473_v29, -1000000.0  ;;  %v903_v31 = vpop.f32.mrb[1].mxu0 }
 0x132   : > { %v476_v32 = vpop.f32.mrb[2].mxu0  ;;  %v495_v33 = vsel %vm494_vm3, %v492_v30, -2000000.0 }
 0x133   : > { %v493_v34 = vsel %vm491_vm4, %v476_v32, -1000000.0  ;;  %v904_v35 = vpop.f32.mrb[3].mxu0  ;;  %497 = vmax.xlane.f32.xlu1 %v495_v33 }
 0x134   : > { %v496_v36 = vsel %vm494_vm3, %v493_v34, -2000000.0 }
 0x137   : > { %499 = vmax.xlane.f32.xlu1 %v496_v36 }
 0x1c0   : > { %v498_v40 = vpop.xlane.xlu1 %497 }
 0x1c1   : > { %v501_v41 = vsub.f32 %v495_v33, %v498_v40 }
 0x1c3   : > { %v503_v42 = vmul.f32 1.442695, %v501_v41 }
 0x1c4   : > { %v500_v43 = vpop.xlane.xlu1 %499 }
 0x1c5   : > { %1007 = vpow2.f32 %v503_v42  ;;  %v502_v44 = vsub.f32 %v496_v36, %v500_v43 }
 0x1c7   : > { %v505_v45 = vmul.f32 1.442695, %v502_v44 }
 0x1c9   : > { %1009 = vpow2.f32 %v505_v45 }
 0x1cf   : > { %v1008_v46 = vpop.eup %1007 }
 0x1d0   : > { %507 = vadd.xlane.f32.xlu0 %v1008_v46 }
 0x1d3   : > { %v1010_v47 = vpop.eup %1009 }
 0x1d4   : > { %509 = vadd.xlane.f32.xlu1 %v1010_v47 }
 0x25d   : > { %v508_v53 = vpop.xlane.xlu0 %507 }
 0x25e   : > { %1011 = vrcp.f32 %v508_v53 }
 0x261   : > { %v510_v54 = vpop.xlane.xlu1 %509 }
 0x262   : > { %1013 = vrcp.f32 %v510_v54 }
 0x268   : > { %v1012_v55 = vpop.eup %1011 }
 0x269   : > { %v513_v56 = vmul.f32 %v1012_v55, %v1008_v46 }
 0x26b   : > { %623 = vst [vmem:[%s311_s10] sm:$0xff] %v513_v56 }
 0x26c   : > { %v1014_v57 = vpop.eup %1013 }
 0x26d   : > { %v514_v58 = vmul.f32 %v1014_v57, %v1010_v47 }
 0x26f   : > { %v515_v59 = vpack.c.bf16 %v514_v58, %v513_v56  ;;  %624 = vst [vmem:[%s311_s10 + $0x8] sm:$0xff] %v514_v58 }
 0x271   : > { %922 = vmatmul.mubr.bf16.vlgmr.msra.gmra.mrb[0].mxu1 %v515_v59 }
 0x272   : > { %1028 = shalt.err (!%p1025_p5)
}
 0x273   : > { %s1029_s29 = scalar_lea.hbm %s1303_s15, 256  ;;  %s1033_s13 = scalar_lea.hbm %s1397_s5, 512 }
 0x274   : > { %p1030_p6 = scmp.ne.s32.totalorder %s1303_s15, %s1029_s29  ;;  %p1034_p10 = scmp.lt.u32.totalorder %s1303_s15, %s1397_s5 }
 0x275   : > { %p1035_p11 = scmp.lt.u32.totalorder %s1033_s13, %s1029_s29  ;;  %p1037_p13 = scmp.lt.u32.totalorder %s1029_s29, %s1303_s15 }
 0x276   : > { %p1031_p7 = pnand %p1030_p6, %p1204_p4 }
 0x277   : > { %p1036_p12 = por %p1035_p11, %p1034_p10 }
 0x278   : > { %p1032_p9 = pneg %p1031_p7 }
 0x279   : > { %p1038_p0 = por %p1037_p13, %p1036_p12 }
 0x27b   : > { %p1039_p1 = pnand %p1038_p0, %p1032_p9 }
 0x27d   : > { %1042 = shalt.err (!%p1039_p1)
}
 0x27e   : > { %s1131_s17 = smov 128   ;;  %s1132_s25 = smov 8  }
 0x27f   : > { %926 = dma.vmem_to_hbm [thread:$0]  (%p1204_p4), %s1295_s11, 256, %s1303_s15, %s631_s16, %s1131_s17, %s1131_s17, %s1132_s25  }
 0x280   : > { %s304_s27 = scalar_lea.vmem [#allocation2], %s825_s8  ;;  %s1341_s13 = scalar_lea.hbm %s1396_s4, %s865_s12 }
 0x281   : > { %s646_s29 = sshll.u32 %s304_s27, 4  ;;  %s626_s11 = scalar_lea.sflag [#allocation3], %s1290_s7  ;;  %s1334_s29 = int_to_ptr.vmem [resolvable:$true] %s646_s29 }
 0x282   : > { %s1043_s8 = scalar_lea.vmem %s1334_s29, 256  ;;  %s1133_s15 = smov [#allocation2]  }
 0x283   : > { %p1044_p2 = scmp.ne.s32.totalorder %s1334_s29, %s1043_s8  ;;  %s1047_s16 = sshll.u32 %s1133_s15, 4  ;;  %s1048_s16 = int_to_ptr.vmem [resolvable:$false] %s1047_s16 }
 0x284   : > { %s1049_s14 = scalar_lea.vmem %s1048_s16, 512  ;;  %p1050_p6 = scmp.lt.s32.totalorder %s1334_s29, %s1048_s16 }
 0x285   : > { %p1045_p3 = pnand %p1044_p2, %p1204_p4  ;;  %p1051_p7 = scmp.lt.s32.totalorder %s1049_s14, %s1043_s8 }
 0x287   : > { %p1046_p5 = pneg %p1045_p3  ;;  %p1052_p9 = por %p1051_p7, %p1050_p6 }
 0x289   : > { %p1053_p10 = pnand %p1052_p9, %p1046_p5 }
 0x344   : > { %v614_v60 = vpop.f32.mrb[0].mxu1 }
 0x345   : > { %621 = vst [vmem:[%s304_s27] sm:$0xff] %v614_v60  ;;  %v923_v61 = vpop.f32.mrb[1].mxu1 }
 0x346   : > { %v617_v62 = vpop.f32.mrb[2].mxu1 }
 0x347   : > { %622 = vst [vmem:[%s304_s27 + $0x8] sm:$0xff] %v617_v62  ;;  %v924_v63 = vpop.f32.mrb[3].mxu1 }
 0x348   : > { %1056 = shalt.err (!%p1053_p10)
}
 0x349   : > { %s1057_s21 = scalar_lea.hbm %s1341_s13, 256  ;;  %s1061_s27 = scalar_lea.hbm %s1396_s4, 512 }
 0x34a   : > { %p1058_p11 = scmp.ne.s32.totalorder %s1341_s13, %s1057_s21  ;;  %p1062_p0 = scmp.lt.u32.totalorder %s1341_s13, %s1396_s4 }
 0x34b   : > { %p1063_p1 = scmp.lt.u32.totalorder %s1061_s27, %s1057_s21  ;;  %p1065_p3 = scmp.lt.u32.totalorder %s1057_s21, %s1341_s13 }
 0x34c   : > { %p1059_p12 = pnand %p1058_p11, %p1204_p4 }
 0x34d   : > { %p1064_p2 = por %p1063_p1, %p1062_p0 }
 0x34e   : > { %p1060_p13 = pneg %p1059_p12 }
 0x34f   : > { %p1066_p5 = por %p1065_p3, %p1064_p2 }
 0x351   : > { %p1067_p6 = pnand %p1066_p5, %p1060_p13 }
 0x353   : > { %1070 = shalt.err (!%p1067_p6)
}
 0x354   : > { %925 = dma.vmem_to_hbm [thread:$0]  (%p1204_p4), %s1334_s29, 256, %s1341_s13, %s626_s11, %s1131_s17, %s1131_s17, %s1132_s25  }
 0x355 PF: > { %p936_p7 = scmp.ge.s32.totalorder %s1125_s23, 2  ;;  %s679_s8 = sand.u32 1, %s1105_s18  }
 0x356   : > { %s680_s15 = scalar_lea.sflag [#allocation3], %s679_s8 }
 0x357   : > { %p930_p9 = pnand %p936_p7, %p1211_p8 }
 0x359   : > { %1096 = dma.done.wait (!%p930_p9), %s680_s15, 256  }
 0x35a   : > { %1098 = vsyncadd (!%p930_p9), %s680_s15, 4294967040  ;;  %s689_s28 = scalar_lea.sflag [#allocation5], %s679_s8 }
 0x35b   : > { %1100 = dma.done.wait (!%p930_p9), %s689_s28, 256  }
 0x35c   : > { %1102 = vsyncadd (!%p930_p9), %s689_s28, 4294967040  ;;  %s22_s23 = sadd.s32 1, %s1125_s23   ;;  %s1400_s18 = smov %s1109_s19 }
 0x35d   : > { %p19_p10 = scmp.ge.s32.totalorder %s22_s23, 4   ;;  %s1401_s19 = smov %s1113_s20 }
 0x35e   : > { %s1402_s20 = smov %s1217_s6  ;;  %s1403_s21 = smov %s1121_s22 }
 0x35f   : > { %s1404_s22 = smov %s1406_s26  ;;  %21 = sbr.rel (!%p19_p10) target bundleno = 6 (0x6), region = 97 }
 0x366   :  { %694 = vsyncpa [#allocation3], 1 }
 0x367   :  { %696 = vsyncpa [#allocation3 + $0x1], 1 }
 0x368   :  { %697 = vsyncpa [#allocation5], 1 }
 0x369   :  { %699 = vsyncpa [#allocation5 + $0x1], 1 }

</bundles_post_ra>
